<compile_context>
chip_gen: v6e
topology: v6e:2x2x1
jax: 0.10.0
libtpu: 0.0.40
codegen_flags: <defaults>
</compile_context>

<pallas_src>
import jax
import jax.numpy as jnp
from jax.experimental import pallas as pl
from jax.experimental.pallas import tpu as pltpu


def _round_up(n: int, m: int) -> int:
    return ((n + m - 1) // m) * m


def _make_kernel(training: bool, drop_p: float, tile_b: int, d_hid: int,
                 inkernel_rng: bool):
    if training:
        # keep iff bits >= round(p * 2^32)  ->  P(keep) = 1 - p.  Plain Python int so it
        # lowers as a literal (no captured array constant).
        keep_thresh = min(int(round(drop_p * 4294967296.0)), 4294967295)
        scale = 1.0 / (1.0 - drop_p)

    def kernel(*refs):
        if training and inkernel_rng:
            x_ref, seed_ref, w1_ref, b1_ref, w2_ref, b2_ref, o_ref = refs
        elif training:
            x_ref, bits_ref, w1_ref, b1_ref, w2_ref, b2_ref, o_ref = refs
        else:
            x_ref, w1_ref, b1_ref, w2_ref, b2_ref, o_ref = refs

        # ---- ln1: (TILE_B,784)bf16 @ (784,256)bf16 -> f32 acc, + bias (f32) ----
        h = jnp.dot(x_ref[...], w1_ref[...],
                    preferred_element_type=jnp.float32) + b1_ref[...]

        # ---- dropout(p) with inverted 1/(1-p) scaling (PyTorch semantics) ----
        if training:
            if inkernel_rng:
                # Per-tile independent stream: seed combined with the grid step.
                pltpu.prng_seed(seed_ref[0], pl.program_id(0))
                bits = pltpu.prng_random_bits((tile_b, d_hid))
            else:
                bits = bits_ref[...]
            if bits.dtype != jnp.uint32:          # static check; older jax returns int32
                bits = pltpu.bitcast(bits, jnp.uint32)
            keep = bits >= keep_thresh            # single VPU compare per element
            h = jnp.where(keep, h * scale, 0.0)

        # ---- sigmoid (EUP path, f32 for v5e portability) ----
        h = jax.nn.sigmoid(h)

        # ---- ln2: (TILE_B,256)bf16 @ (256,128)bf16 -> f32 acc, + padded bias, bf16 out ----
        o_ref[...] = (jnp.dot(h.astype(jnp.bfloat16), w2_ref[...],
                              preferred_element_type=jnp.float32)
                      + b2_ref[...]).astype(o_ref.dtype)

    return kernel


def bn_and_dp_forward(x, w1, b1, w2, b2, *, training=False, drop_p=0.2,
                      seed=0, tile_b=1024, inkernel_rng=True):
    """x: (B,784) f32; w1: (256,784); b1: (256,); w2: (10,256); b2: (10,). Returns (B,10) f32."""
    B, d_in = x.shape
    d_hid = w1.shape[0]
    d_out = w2.shape[0]
    d_out_pad = 128                                   # lane-dense output width

    # Batch tile: multiple of 8, no larger than the (8-padded) batch.
    tile_b = max(8, min(_round_up(tile_b, 8), _round_up(B, 8)))
    # v7x has 2 TensorCores sharing the (parallel) batch grid: for big batches keep >= 2 grid
    # steps so neither core idles.  v5e/v6e (1 TC) are unaffected.
    if B >= 512:
        tile_b = min(tile_b, _round_up((B + 1) // 2, 8))
    b_pad = _round_up(B, tile_b)
    # NOTE: tiles > ~2048 rows in training mode would need vmem_limit_bytes on v5e (16 MiB
    # default scoped VMEM); the 1024 default stays well under every generation's default.

    # Cast to bf16 BEFORE padding: avoids materializing a padded f32 copy in HBM.
    x_bf = x.astype(jnp.bfloat16)
    if b_pad != B:
        x_bf = jnp.pad(x_bf, ((0, b_pad - B), (0, 0)))

    w1_t = w1.T.astype(jnp.bfloat16)                                  # (784, 256) resident
    b1_r = b1.reshape(1, -1).astype(jnp.float32)                      # (1, 256)
    w2_t = jnp.zeros((d_hid, d_out_pad), jnp.bfloat16).at[:, :d_out].set(
        w2.T.astype(jnp.bfloat16))                                    # (256, 128) zero-padded
    b2_r = jnp.zeros((1, d_out_pad), jnp.float32).at[:, :d_out].set(
        b2.astype(jnp.float32))                                       # (1, 128) zero-padded

    grid = (b_pad // tile_b,)
    kernel = _make_kernel(training, drop_p, tile_b, d_hid, inkernel_rng)

    in_specs = [pl.BlockSpec((tile_b, d_in), lambda i: (i, 0))]       # x tile
    args = [x_bf]
    if training:
        if inkernel_rng:
            in_specs.append(pl.BlockSpec(memory_space=pltpu.MemorySpace.SMEM))
            args.append(jnp.asarray([seed], dtype=jnp.int32))         # scalar seed in SMEM
        else:
            bits = jax.random.bits(jax.random.PRNGKey(seed), (b_pad, d_hid),
                                   dtype=jnp.uint32)
            in_specs.append(pl.BlockSpec((tile_b, d_hid), lambda i: (i, 0)))
            args.append(bits)
    in_specs += [
        pl.BlockSpec((d_in, d_hid), lambda i: (0, 0)),                # W1^T  (resident)
        pl.BlockSpec((1, d_hid), lambda i: (0, 0)),                   # b1    (resident)
        pl.BlockSpec((d_hid, d_out_pad), lambda i: (0, 0)),           # W2^T  (resident, padded)
        pl.BlockSpec((1, d_out_pad), lambda i: (0, 0)),               # b2    (resident, padded)
    ]
    args += [w1_t, b1_r, w2_t, b2_r]

    out = pl.pallas_call(
        kernel,
        out_shape=jax.ShapeDtypeStruct((b_pad, d_out_pad), jnp.bfloat16),  # bf16 writeback
        grid=grid,
        in_specs=in_specs,
        out_specs=pl.BlockSpec((tile_b, d_out_pad), lambda i: (i, 0)),
        compiler_params=pltpu.CompilerParams(
            dimension_semantics=("parallel",)),
    )(*args)

    return out[:B, :d_out].astype(jnp.float32)


def reference_forward(x, w1, b1, w2, b2):
    # Eval-mode (dropout = identity) pure-JAX reference.
    h = x @ w1.T + b1
    h = jax.nn.sigmoid(h)
    return h @ w2.T + b2


if __name__ == "__main__":
    key = jax.random.PRNGKey(0)
    k_x, k_w1, k_b1, k_w2, k_b2 = jax.random.split(key, 5)

    B, D_IN, D_HID, D_OUT = 8, 784, 256, 10

    x = jax.random.normal(k_x, (B, D_IN), dtype=jnp.float32)

    # Deterministic PyTorch-style init: U(-1/sqrt(fan_in), 1/sqrt(fan_in)).
    bound1 = 1.0 / jnp.sqrt(D_IN)
    w1 = jax.random.uniform(k_w1, (D_HID, D_IN), jnp.float32, -bound1, bound1)
    b1 = jax.random.uniform(k_b1, (D_HID,), jnp.float32, -bound1, bound1)
    bound2 = 1.0 / jnp.sqrt(D_HID)
    w2 = jax.random.uniform(k_w2, (D_OUT, D_HID), jnp.float32, -bound2, bound2)
    b2 = jax.random.uniform(k_b2, (D_OUT,), jnp.float32, -bound2, bound2)

    # Eval mode (deterministic): dropout is identity; must match the f32 reference up to
    # bf16 MXU-input / bf16-output rounding.
    out = jax.block_until_ready(bn_and_dp_forward(x, w1, b1, w2, b2, training=False))
    ref = reference_forward(x, w1, b1, w2, b2)
    assert out.shape == (B, D_OUT)
    assert jnp.allclose(out, ref, atol=2e-2, rtol=2e-2), "eval-mode mismatch vs reference"

    # Training mode: dropout active via in-kernel PRNG; fall back to a host-generated uint32
    # bit stream if the TPU PRNG primitives are unavailable (e.g. CPU interpret mode).
    try:
        out_train = jax.block_until_ready(
            bn_and_dp_forward(x, w1, b1, w2, b2, training=True, seed=1234))
    except Exception:
        out_train = jax.block_until_ready(
            bn_and_dp_forward(x, w1, b1, w2, b2, training=True, seed=1234,
                              inkernel_rng=False))
    assert out_train.shape == (B, D_OUT)
    assert bool(jnp.all(jnp.isfinite(out_train)))
    # Dropout must actually perturb the output: with p=0.2 every kept pre-activation is scaled
    # by 1.25 and ~20% of 8x256 units are zeroed, so training output != eval output.
    assert not jnp.allclose(out_train, out, atol=1e-4), "dropout appears inactive"

    print("KERNEL_OK")
</pallas_src>

<mosaic_0001>
module attributes {stable_mosaic.version = 11 : i64} {
  func.func @kernel(%arg0: i32, %arg1: memref<8x784xbf16, #tpu.memory_space<vmem>>, %arg2: memref<784x256xbf16, #tpu.memory_space<vmem>>, %arg3: memref<1x256xf32, #tpu.memory_space<vmem>>, %arg4: memref<256x128xbf16, #tpu.memory_space<vmem>>, %arg5: memref<1x128xf32, #tpu.memory_space<vmem>>, %arg6: memref<8x128xbf16, #tpu.memory_space<vmem>>) attributes {dimension_semantics = [#tpu.dimension_semantics<parallel>], iteration_bounds = array<i64: 1>, scalar_prefetch = 0 : i64, scratch_operands = 0 : i64, tpu.core_type = #tpu.core_type<tc>, window_params = [{transform_indices = @transform_0, window_bounds = array<i64: 8, 784>}, {pipeline_mode = #tpu.pipeline_mode<synchronous>, transform_indices = @transform_1, window_bounds = array<i64: 784, 256>}, {pipeline_mode = #tpu.pipeline_mode<synchronous>, transform_indices = @transform_2, window_bounds = array<i64: 1, 256>}, {pipeline_mode = #tpu.pipeline_mode<synchronous>, transform_indices = @transform_3, window_bounds = array<i64: 256, 128>}, {pipeline_mode = #tpu.pipeline_mode<synchronous>, transform_indices = @transform_4, window_bounds = array<i64: 1, 128>}, {transform_indices = @transform_5, window_bounds = array<i64: 8, 128>}]} {
    %c0 = arith.constant 0 : index
    %c0_0 = arith.constant 0 : index
    %0 = vector.load %arg1[%c0, %c0_0] : memref<8x784xbf16, #tpu.memory_space<vmem>>, vector<8x784xbf16>
    %c0_1 = arith.constant 0 : index
    %c0_2 = arith.constant 0 : index
    %1 = vector.load %arg2[%c0_1, %c0_2] : memref<784x256xbf16, #tpu.memory_space<vmem>>, vector<784x256xbf16>
    %cst = arith.constant dense<0.000000e+00> : vector<8x256xf32>
    %2 = tpu.matmul %0, %1, %cst {dimension_numbers = #tpu.dot_dimension_numbers<[1], [0], [0], [1], [0, 0, 1, 1], [], []>} : vector<8x784xbf16>, vector<784x256xbf16>, vector<8x256xf32> -> vector<8x256xf32>
    %c0_3 = arith.constant 0 : index
    %c0_4 = arith.constant 0 : index
    %3 = vector.load %arg3[%c0_3, %c0_4] : memref<1x256xf32, #tpu.memory_space<vmem>>, vector<1x256xf32>
    %4 = vector.broadcast %3 : vector<1x256xf32> to vector<8x256xf32>
    %5 = arith.addf %2, %4 : vector<8x256xf32>
    %6 = arith.negf %5 : vector<8x256xf32>
    %7 = math.exp %6 : vector<8x256xf32>
    %cst_5 = arith.constant 1.000000e+00 : f32
    %8 = vector.broadcast %cst_5 : f32 to vector<8x256xf32>
    %9 = arith.addf %8, %7 : vector<8x256xf32>
    %10 = arith.divf %8, %9 : vector<8x256xf32>
    %11 = arith.truncf %10 : vector<8x256xf32> to vector<8x256xbf16>
    %c0_6 = arith.constant 0 : index
    %c0_7 = arith.constant 0 : index
    %12 = vector.load %arg4[%c0_6, %c0_7] : memref<256x128xbf16, #tpu.memory_space<vmem>>, vector<256x128xbf16>
    %cst_8 = arith.constant dense<0.000000e+00> : vector<8x128xf32>
    %13 = tpu.matmul %11, %12, %cst_8 {dimension_numbers = #tpu.dot_dimension_numbers<[1], [0], [0], [1], [0, 0, 1, 1], [], []>} : vector<8x256xbf16>, vector<256x128xbf16>, vector<8x128xf32> -> vector<8x128xf32>
    %c0_9 = arith.constant 0 : index
    %c0_10 = arith.constant 0 : index
    %14 = vector.load %arg5[%c0_9, %c0_10] : memref<1x128xf32, #tpu.memory_space<vmem>>, vector<1x128xf32>
    %15 = vector.broadcast %14 : vector<1x128xf32> to vector<8x128xf32>
    %16 = arith.addf %13, %15 : vector<8x128xf32>
    %17 = arith.truncf %16 : vector<8x128xf32> to vector<8x128xbf16>
    %c0_11 = arith.constant 0 : index
    %c0_12 = arith.constant 0 : index
    %18 = vector.load %arg6[%c0_11, %c0_12] : memref<8x128xbf16, #tpu.memory_space<vmem>>, vector<8x128xbf16>
    tpu.vector_store %arg6[%c0_11, %c0_12], %17 {strides = array<i32>} : memref<8x128xbf16, #tpu.memory_space<vmem>>, vector<8x128xbf16>,
    return
  }
  func.func @transform_0(%arg0: i32) -> (i32, i32) {
    %c0_i32 = arith.constant 0 : i32
    %c0_i32_0 = arith.constant 0 : i32
    return %arg0, %c0_i32 : i32, i32
  }
  func.func @transform_1(%arg0: i32) -> (i32, i32) {
    %c0_i32 = arith.constant 0 : i32
    %c0_i32_0 = arith.constant 0 : i32
    %c0_i32_1 = arith.constant 0 : i32
    return %c0_i32, %c0_i32_0 : i32, i32
  }
  func.func @transform_2(%arg0: i32) -> (i32, i32) {
    %c0_i32 = arith.constant 0 : i32
    %c0_i32_0 = arith.constant 0 : i32
    %c0_i32_1 = arith.constant 0 : i32
    return %c0_i32, %c0_i32_0 : i32, i32
  }
  func.func @transform_3(%arg0: i32) -> (i32, i32) {
    %c0_i32 = arith.constant 0 : i32
    %c0_i32_0 = arith.constant 0 : i32
    %c0_i32_1 = arith.constant 0 : i32
    return %c0_i32, %c0_i32_0 : i32, i32
  }
  func.func @transform_4(%arg0: i32) -> (i32, i32) {
    %c0_i32 = arith.constant 0 : i32
    %c0_i32_0 = arith.constant 0 : i32
    %c0_i32_1 = arith.constant 0 : i32
    return %c0_i32, %c0_i32_0 : i32, i32
  }
  func.func @transform_5(%arg0: i32) -> (i32, i32) {
    %c0_i32 = arith.constant 0 : i32
    %c0_i32_0 = arith.constant 0 : i32
    return %arg0, %c0_i32 : i32, i32
  }
}

</mosaic_0001>

<bundles_post_ra>
// kernel: tpu_custom_call.1
= control target key start
LH: loop header
LB: loop body
LE: loop exit
PB: predicated region body
PF: predicated region fallthrough
CT: control target
= control target key end

     0   :  { %10 = vsyncpa [#allocation3], 0  ;;  %s1548_s0 = inlined_call_operand.hbm [shape: bf16[8,784], index: 0, kind: input, shape index: {}]   ;;  %s1549_s1 = inlined_call_operand.hbm [shape: bf16[784,256], index: 1, kind: input, shape index: {}]   ;;  %s1550_s2 = inlined_call_operand.vmem [shape: f32[1,256], index: 2, kind: input, shape index: {}]   ;;  %s1551_s3 = inlined_call_operand.hbm [shape: bf16[256,128], index: 3, kind: input, shape index: {}]   ;;  %s1552_s4 = inlined_call_operand.vmem [shape: f32[1,128], index: 4, kind: input, shape index: {}]   ;;  %s1553_s5 = inlined_call_operand.hbm [shape: bf16[8,128], index: 5, kind: output, shape index: {}]  }
   0x1   :  { %11 = vsyncpa [#allocation6], 0 }
   0x2   :  { %12 = vsyncpa [#allocation4], 0  ;;  %s1484_s18 = smov [#allocation5]  }
   0x3   :  { %s28_s19 = sshll.u32 %s1484_s18, 4  ;;  %s29_s19 = int_to_ptr.vmem [resolvable:$true] %s28_s19 }
   0x4   :  { %s1406_s20 = scalar_lea.vmem %s29_s19, 12544  ;;  %p1411_p1 = scmp.lt.s32.totalorder %s29_s19, %s29_s19 }
   0x5   :  { %p1407_p0 = scmp.ne.s32.totalorder %s29_s19, %s1406_s20  ;;  %p1412_p2 = scmp.lt.s32.totalorder %s1406_s20, %s1406_s20 }
   0x7   :  { %p1413_p3 = por %p1412_p2, %p1411_p1 }
   0x9   :  { %p1414_p4 = pnand %p1413_p3, %p1407_p0 }
   0xb   :  { %1417 = shalt.err (!%p1414_p4)
}
   0xc   :  { %s1485_s21 = smov 128   ;;  %s1486_s22 = smov 8  }
   0xd   :  { %34 = dma.hbm_to_vmem [thread:$0]  %s1549_s1, 12544, %s29_s19, [#allocation6], %s1485_s21, %s1485_s21, %s1486_s22  }
   0xe   :  { %s1487_s25 = smov [#allocation2]   ;;  %s1488_s27 = smov [#allocation7]  }
   0xf   :  { %s19_s26 = sshll.u32 %s1487_s25, 4  ;;  %s42_s28 = sshll.u32 %s1488_s27, 4  ;;  %s20_s26 = int_to_ptr.vmem [resolvable:$true] %s19_s26  ;;  %s43_s28 = int_to_ptr.vmem [resolvable:$true] %s42_s28 }
  0x10   :  { %s1426_s29 = scalar_lea.vmem %s20_s26, 448  ;;  %p1431_p6 = scmp.lt.s32.totalorder %s20_s26, %s20_s26 }
  0x11   :  { %p1427_p5 = scmp.ne.s32.totalorder %s20_s26, %s1426_s29  ;;  %p1432_p7 = scmp.lt.s32.totalorder %s1426_s29, %s1426_s29 }
  0x13   :  { %p1433_p8 = por %p1432_p7, %p1431_p6 }
  0x15   :  { %p1434_p9 = pnand %p1433_p8, %p1427_p5 }
  0x17   :  { %1437 = shalt.err (!%p1434_p9)
}
  0x18   :  { %22 = dma.hbm_to_vmem [thread:$0]  %s1548_s0, 448, %s20_s26, [#allocation3]  }
  0x19   :  { %s1446_s7 = scalar_lea.vmem %s43_s28, 2048  ;;  %p1451_p11 = scmp.lt.s32.totalorder %s43_s28, %s43_s28 }
  0x1a   :  { %p1447_p10 = scmp.ne.s32.totalorder %s43_s28, %s1446_s7  ;;  %p1452_p12 = scmp.lt.s32.totalorder %s1446_s7, %s1446_s7 }
  0x1c   :  { %p1453_p13 = por %p1452_p12, %p1451_p11 }
  0x1e   :  { %p1454_p0 = pnand %p1453_p13, %p1447_p10 }
  0x20   :  { %1457 = shalt.err (!%p1454_p0)
}
  0x21   :  { %s1489_s1 = smov 64   ;;  %s1490_s8 = smov 4  }
  0x22   :  { %48 = dma.hbm_to_vmem [thread:$0]  %s1551_s3, 2048, %s43_s28, [#allocation6], %s1489_s1, %s1489_s1, %s1490_s8  }
  0x23   :  { %1478 = dma.done.wait [#allocation3], 448  }
  0x24   :  { %1479 = vsyncadd [#allocation3], 4294966848 }
  0x25   :  { %1480 = dma.done.wait [#allocation6], 14592  }
  0x26   :  { %1481 = vsyncadd [#allocation6], 4294952704  ;;  %v1220_v0 = vld [vmem:[#allocation5 + $0x74] ss:$8 sps:$4 sm:$0xff]   ;;  %v1222_v1 = vld [vmem:[#allocation5 + $0x70] ss:$8 sps:$4 sm:$0xff]  }
  0x27   :  { %693 = vmatprep.subr.bf16.mxu0 %v1220_v0  ;;  %v1223_v2 = vld [vmem:[#allocation5 + $0x174] ss:$8 sps:$4 sm:$0xff]   ;;  %v1225_v3 = vld [vmem:[#allocation5 + $0x170] ss:$8 sps:$4 sm:$0xff]   ;;  %v1226_v4 = vld [vmem:[#allocation5 + $0x64] ss:$8 sps:$4 sm:$0xff]  }
  0x28   :  { %694 = vmatpush1.bf16.msra.mxu0 %v1222_v1  ;;  %v1228_v5 = vld [vmem:[#allocation5 + $0x60] ss:$8 sps:$4 sm:$0xff]   ;;  %734 = vmatprep.subr.bf16.mxu1 %v1223_v2  ;;  %v1229_v6 = vld [vmem:[#allocation5 + $0x164] ss:$8 sps:$4 sm:$0xff]   ;;  %v1232_v8 = vld [vmem:[#allocation5 + $0x54] ss:$8 sps:$4 sm:$0xff]  }
  0x29   :  { %735 = vmatpush1.bf16.msra.mxu1 %v1225_v3  ;;  %695 = vmatprep.subr.bf16.mxu0 %v1226_v4  ;;  %v1231_v7 = vld [vmem:[#allocation5 + $0x160] ss:$8 sps:$4 sm:$0xff]   ;;  %v1234_v9 = vld [vmem:[#allocation5 + $0x50] ss:$8 sps:$4 sm:$0xff]   ;;  %v1235_v10 = vld [vmem:[#allocation5 + $0x154] ss:$8 sps:$4 sm:$0xff]  }
  0x2a   :  { %736 = vmatprep.subr.bf16.mxu1 %v1229_v6  ;;  %v1238_v11 = vld [vmem:[#allocation5 + $0x44] ss:$8 sps:$4 sm:$0xff]   ;;  %v1237_v12 = vld [vmem:[#allocation5 + $0x150] ss:$8 sps:$4 sm:$0xff]   ;;  %v1240_v14 = vld [vmem:[#allocation5 + $0x40] ss:$8 sps:$4 sm:$0xff]  }
  0x2b   :  { %v1241_v13 = vld [vmem:[#allocation5 + $0x144] ss:$8 sps:$4 sm:$0xff]   ;;  %v1244_v15 = vld [vmem:[#allocation5 + $0x34] ss:$8 sps:$4 sm:$0xff]   ;;  %v1243_v16 = vld [vmem:[#allocation5 + $0x140] ss:$8 sps:$4 sm:$0xff]  }
  0x2c   :  { %696 = vmatpush1.bf16.msra.mxu0 %v1228_v5  ;;  %v1247_v17 = vld [vmem:[#allocation5 + $0x134] ss:$8 sps:$4 sm:$0xff]   ;;  %v1246_v18 = vld [vmem:[#allocation5 + $0x30] ss:$8 sps:$4 sm:$0xff]   ;;  %v1250_v19 = vld [vmem:[#allocation5 + $0x24] ss:$8 sps:$4 sm:$0xff]  }
  0x2d   :  { %697 = vmatprep.subr.bf16.mxu0 %v1232_v8  ;;  %737 = vmatpush1.bf16.msra.mxu1 %v1231_v7  ;;  %v1249_v20 = vld [vmem:[#allocation5 + $0x130] ss:$8 sps:$4 sm:$0xff]   ;;  %v1253_v21 = vld [vmem:[#allocation5 + $0x124] ss:$8 sps:$4 sm:$0xff]   ;;  %v1252_v22 = vld [vmem:[#allocation5 + $0x20] ss:$8 sps:$4 sm:$0xff]  }
  0x2e   :  { %738 = vmatprep.subr.bf16.mxu1 %v1235_v10  ;;  %v1256_v23 = vld [vmem:[#allocation5 + $0x14] ss:$8 sps:$4 sm:$0xff]   ;;  %v1255_v24 = vld [vmem:[#allocation5 + $0x120] ss:$8 sps:$4 sm:$0xff]   ;;  %v1258_v26 = vld [vmem:[#allocation5 + $0x10] ss:$8 sps:$4 sm:$0xff]  }
  0x2f   :  { %v1259_v25 = vld [vmem:[#allocation5 + $0x114] ss:$8 sps:$4 sm:$0xff]   ;;  %v1262_v27 = vld [vmem:[#allocation5 + $0x4] ss:$8 sps:$4 sm:$0xff]   ;;  %v1261_v28 = vld [vmem:[#allocation5 + $0x110] ss:$8 sps:$4 sm:$0xff]  }
  0x30   :  { %698 = vmatpush1.bf16.msra.mxu0 %v1234_v9  ;;  %v1265_v29 = vld [vmem:[#allocation5 + $0x104] ss:$8 sps:$4 sm:$0xff]   ;;  %v1264_v30 = vld [vmem:[#allocation5] ss:$8 sps:$4 sm:$0xff]   ;;  %v1268_v31 = vld [vmem:[#allocation5 + $0xf4] ss:$8 sps:$4 sm:$0xff]  }
  0x31   :  { %699 = vmatprep.subr.bf16.mxu0 %v1238_v11  ;;  %739 = vmatpush1.bf16.msra.mxu1 %v1237_v12  ;;  %v1267_v32 = vld [vmem:[#allocation5 + $0x100] ss:$8 sps:$4 sm:$0xff]   ;;  %v1271_v33 = vld [vmem:[#allocation5 + $0x1f4] ss:$8 sps:$4 sm:$0xff]   ;;  %v1270_v34 = vld [vmem:[#allocation5 + $0xf0] ss:$8 sps:$4 sm:$0xff]  }
  0x32   :  { %740 = vmatprep.subr.bf16.mxu1 %v1241_v13  ;;  %v1274_v35 = vld [vmem:[#allocation5 + $0xe4] ss:$8 sps:$4 sm:$0xff]   ;;  %v1273_v36 = vld [vmem:[#allocation5 + $0x1f0] ss:$8 sps:$4 sm:$0xff]   ;;  %v1276_v38 = vld [vmem:[#allocation5 + $0xe0] ss:$8 sps:$4 sm:$0xff]  }
  0x33   :  { %v1277_v37 = vld [vmem:[#allocation5 + $0x1e4] ss:$8 sps:$4 sm:$0xff]   ;;  %v1280_v39 = vld [vmem:[#allocation5 + $0xd4] ss:$8 sps:$4 sm:$0xff]   ;;  %v1279_v40 = vld [vmem:[#allocation5 + $0x1e0] ss:$8 sps:$4 sm:$0xff]  }
  0x34   :  { %700 = vmatpush1.bf16.msra.mxu0 %v1240_v14  ;;  %v1283_v41 = vld [vmem:[#allocation5 + $0x1d4] ss:$8 sps:$4 sm:$0xff]   ;;  %v1282_v42 = vld [vmem:[#allocation5 + $0xd0] ss:$8 sps:$4 sm:$0xff]   ;;  %v1286_v43 = vld [vmem:[#allocation5 + $0xc4] ss:$8 sps:$4 sm:$0xff]  }
  0x35   :  { %701 = vmatprep.subr.bf16.mxu0 %v1244_v15  ;;  %741 = vmatpush1.bf16.msra.mxu1 %v1243_v16  ;;  %v1285_v44 = vld [vmem:[#allocation5 + $0x1d0] ss:$8 sps:$4 sm:$0xff]   ;;  %v1289_v45 = vld [vmem:[#allocation5 + $0x1c4] ss:$8 sps:$4 sm:$0xff]   ;;  %v1288_v47 = vld [vmem:[#allocation5 + $0xc0] ss:$8 sps:$4 sm:$0xff]  }
  0x36   :  { %742 = vmatprep.subr.bf16.mxu1 %v1247_v17  ;;  %v61_v46 = vld [vmem:[#allocation2] sm:$0xff]  ;;  %v1292_v49 = vld [vmem:[#allocation5 + $0xb4] ss:$8 sps:$4 sm:$0xff]   ;;  %v62_v50 = vld [vmem:[#allocation2 + $0x8] sm:$0xff]  ;;  %vm689_vm0 = vcmask 130048   ;;  %v1491_v16 = vmov 0  }
  0x37   :  { %v1065_v48 = vcombine.high %v61_v46, %v61_v46  ;;  %v1291_v51 = vld [vmem:[#allocation5 + $0x1c0] ss:$8 sps:$4 sm:$0xff]   ;;  %v1067_v52 = vcombine.high %v62_v50, %v62_v50  ;;  %v1295_v53 = vld [vmem:[#allocation5 + $0x1b4] ss:$8 sps:$4 sm:$0xff]   ;;  %v1294_v54 = vld [vmem:[#allocation5 + $0xb0] ss:$8 sps:$4 sm:$0xff]   ;;  %v1064_v5 = vcombine.low %v61_v46, %v61_v46  ;;  %v1066_v7 = vcombine.low %v62_v50, %v62_v50 }
  0x38   :  { %702 = vmatpush1.bf16.msra.mxu0 %v1246_v18  ;;  %v1298_v55 = vld [vmem:[#allocation5 + $0xa4] ss:$8 sps:$4 sm:$0xff]   ;;  %v1297_v56 = vld [vmem:[#allocation5 + $0x1b0] ss:$8 sps:$4 sm:$0xff]   ;;  %v1300_v58 = vld [vmem:[#allocation5 + $0xa0] ss:$8 sps:$4 sm:$0xff]  }
  0x39   :  { %703 = vmatprep.subr.bf16.mxu0 %v1250_v19  ;;  %743 = vmatpush1.bf16.msra.mxu1 %v1249_v20  ;;  %v1301_v57 = vld [vmem:[#allocation5 + $0x1a4] ss:$8 sps:$4 sm:$0xff]   ;;  %v1304_v59 = vld [vmem:[#allocation5 + $0x94] ss:$8 sps:$4 sm:$0xff]   ;;  %v1303_v60 = vld [vmem:[#allocation5 + $0x1a0] ss:$8 sps:$4 sm:$0xff]  }
  0x3a   :  { %744 = vmatprep.subr.bf16.mxu1 %v1253_v21  ;;  %725 = vmatprep.mubr.bf16.mxu0 %v1065_v48  ;;  %v1307_v61 = vld [vmem:[#allocation5 + $0x194] ss:$8 sps:$4 sm:$0xff]   ;;  %v1306_v62 = vld [vmem:[#allocation5 + $0x90] ss:$8 sps:$4 sm:$0xff]   ;;  %v1310_v63 = vld [vmem:[#allocation5 + $0x84] ss:$8 sps:$4 sm:$0xff]  }
  0x3b   :  { %766 = vmatprep.mubr.bf16.mxu1 %v1067_v52  ;;  %v1309_v0 = vld [vmem:[#allocation5 + $0x190] ss:$8 sps:$4 sm:$0xff]   ;;  %v1313_v1 = vld [vmem:[#allocation5 + $0x184] ss:$8 sps:$4 sm:$0xff]   ;;  %v1312_v2 = vld [vmem:[#allocation5 + $0x80] ss:$8 sps:$4 sm:$0xff]  }
  0x3c   :  { %704 = vmatpush1.bf16.msra.mxu0 %v1252_v22  ;;  %v1320_v3 = vld [vmem:[#allocation5 + $0x274] ss:$8 sps:$4 sm:$0xff]   ;;  %v1317_v4 = vld [vmem:[#allocation5 + $0x180] ss:$8 sps:$4 sm:$0xff]   ;;  %v1318_v6 = vld [vmem:[#allocation5 + $0x270] ss:$8 sps:$4 sm:$0xff]  }
  0x3d   :  { %705 = vmatprep.subr.bf16.mxu0 %v1256_v23  ;;  %745 = vmatpush1.bf16.msra.mxu1 %v1255_v24  ;;  %v1325_v8 = vld [vmem:[#allocation5 + $0x264] ss:$8 sps:$4 sm:$0xff]   ;;  %v1365_v10 = vld [vmem:[#allocation5 + $0x300] ss:$8 sps:$4 sm:$0xff]   ;;  %v1532_v12 = vld [vmem:[#allocation2 + $0x10] sm:$0xff]  ;;  %s1492_s12 = smov [#allocation8]  }
  0x3e   :  { %746 = vmatprep.subr.bf16.mxu1 %v1259_v25  ;;  %v1367_v9 = vld [vmem:[#allocation5 + $0x304] ss:$8 sps:$4 sm:$0xff]   ;;  %v1323_v11 = vld [vmem:[#allocation5 + $0x260] ss:$8 sps:$4 sm:$0xff]   ;;  %v1328_v13 = vld [vmem:[#allocation5 + $0x254] ss:$8 sps:$4 sm:$0xff]   ;;  %v1069_v14 = vcombine.high %v1532_v12, %v1532_v12 }
  0x3f   :  { %v1326_v15 = vld [vmem:[#allocation5 + $0x250] ss:$8 sps:$4 sm:$0xff]   ;;  %v1331_v17 = vld [vmem:[#allocation5 + $0x244] ss:$8 sps:$4 sm:$0xff]   ;;  %v1371_v18 = vld [vmem:[#allocation2 + $0x18] ss:$0 sps:$4 sm:$0xff]  }
  0x40   :  { %706 = vmatpush1.bf16.msra.mxu0 %v1258_v26  ;;  %v1329_v19 = vld [vmem:[#allocation5 + $0x240] ss:$8 sps:$4 sm:$0xff]   ;;  %v1334_v20 = vld [vmem:[#allocation5 + $0x234] ss:$8 sps:$4 sm:$0xff]   ;;  %v1332_v21 = vld [vmem:[#allocation5 + $0x230] ss:$8 sps:$4 sm:$0xff]  }
  0x41   :  { %707 = vmatprep.subr.bf16.mxu0 %v1262_v27  ;;  %747 = vmatpush1.bf16.msra.mxu1 %v1261_v28  ;;  %v1337_v22 = vld [vmem:[#allocation5 + $0x224] ss:$8 sps:$4 sm:$0xff]   ;;  %v1335_v23 = vld [vmem:[#allocation5 + $0x220] ss:$8 sps:$4 sm:$0xff]   ;;  %v1340_v24 = vld [vmem:[#allocation5 + $0x214] ss:$8 sps:$4 sm:$0xff]  }
  0x42   :  { %748 = vmatprep.subr.bf16.mxu1 %v1265_v29  ;;  %v1338_v25 = vld [vmem:[#allocation5 + $0x210] ss:$8 sps:$4 sm:$0xff]   ;;  %v1343_v26 = vld [vmem:[#allocation5 + $0x204] ss:$8 sps:$4 sm:$0xff]   ;;  %v1341_v27 = vld [vmem:[#allocation5 + $0x200] ss:$8 sps:$4 sm:$0xff]  }
  0x43   :  { %v1346_v28 = vld [vmem:[#allocation5 + $0x2f4] ss:$8 sps:$4 sm:$0xff]   ;;  %v1344_v29 = vld [vmem:[#allocation5 + $0x2f0] ss:$8 sps:$4 sm:$0xff]   ;;  %v1375_v46 = vld [vmem:[#allocation7 + $0x38] sm:$0xff]   ;;  %s1054_s13 = sshll.u32 %s1492_s12, 4  ;;  %s1055_s13 = int_to_ptr.vmem [resolvable:$true] %s1054_s13 }
  0x44   :  { %708 = vmatpush1.bf16.msra.mxu0 %v1264_v30  ;;  %v1349_v30 = vld [vmem:[#allocation5 + $0x2e4] ss:$8 sps:$4 sm:$0xff]   ;;  %v1379_v50 = vld [vmem:[#allocation7 + $0x28] sm:$0xff]   ;;  %v1381_v52 = vld [vmem:[#allocation7 + $0x20] sm:$0xff]   ;;  %s1458_s14 = scalar_lea.vmem %s1055_s13, 64  ;;  %p1463_p2 = scmp.lt.s32.totalorder %s1055_s13, %s1055_s13 }
  0x45   :  { %709 = vmatprep.subr.bf16.mxu0 %v1268_v31  ;;  %749 = vmatpush1.bf16.msra.mxu1 %v1267_v32  ;;  %v1347_v31 = vld [vmem:[#allocation5 + $0x2e0] ss:$8 sps:$4 sm:$0xff]   ;;  %v1352_v32 = vld [vmem:[#allocation5 + $0x2d4] ss:$8 sps:$4 sm:$0xff]   ;;  %p1459_p1 = scmp.ne.s32.totalorder %s1055_s13, %s1458_s14  ;;  %p1464_p3 = scmp.lt.s32.totalorder %s1458_s14, %s1458_s14 }
  0x46   :  { %750 = vmatprep.subr.bf16.mxu1 %v1271_v33  ;;  %v1350_v33 = vld [vmem:[#allocation5 + $0x2d0] ss:$8 sps:$4 sm:$0xff]   ;;  %v1377_v48 = vld [vmem:[#allocation7 + $0x30] sm:$0xff]  }
  0x47   :  { %p1465_p4 = por %p1464_p3, %p1463_p2 }
  0x48   :  { %710 = vmatpush2.bf16.msra.mxu0 %v1270_v34  ;;  %v1355_v34 = vld [vmem:[#allocation5 + $0x2c4] ss:$8 sps:$4 sm:$0xff]  }
  0x49   :  { %711 = vmatprep.subr.bf16.mxu0 %v1274_v35  ;;  %751 = vmatpush2.bf16.msra.mxu1 %v1273_v36  ;;  %v1353_v35 = vld [vmem:[#allocation5 + $0x2c0] ss:$8 sps:$4 sm:$0xff]   ;;  %v1358_v36 = vld [vmem:[#allocation5 + $0x2b4] ss:$8 sps:$4 sm:$0xff]   ;;  %p1466_p5 = pnand %p1465_p4, %p1459_p1 }
  0x4a   :  { %752 = vmatprep.subr.bf16.mxu1 %v1277_v37  ;;  %v1356_v37 = vld [vmem:[#allocation5 + $0x2b0] ss:$8 sps:$4 sm:$0xff]  }
  0x4c   :  { %712 = vmatpush2.bf16.msra.mxu0 %v1276_v38  ;;  %v1361_v38 = vld [vmem:[#allocation5 + $0x2a4] ss:$8 sps:$4 sm:$0xff]  }
  0x4d   :  { %713 = vmatprep.subr.bf16.mxu0 %v1280_v39  ;;  %753 = vmatpush2.bf16.msra.mxu1 %v1279_v40  ;;  %v1359_v39 = vld [vmem:[#allocation5 + $0x2a0] ss:$8 sps:$4 sm:$0xff]   ;;  %v1364_v40 = vld [vmem:[#allocation5 + $0x294] ss:$8 sps:$4 sm:$0xff]  }
  0x4e   :  { %754 = vmatprep.subr.bf16.mxu1 %v1283_v41  ;;  %v1362_v41 = vld [vmem:[#allocation5 + $0x290] ss:$8 sps:$4 sm:$0xff]  }
  0x50   :  { %714 = vmatpush2.bf16.msra.mxu0 %v1282_v42  ;;  %v1370_v42 = vld [vmem:[#allocation5 + $0x284] ss:$8 sps:$4 sm:$0xff]  }
  0x51   :  { %715 = vmatprep.subr.bf16.mxu0 %v1286_v43  ;;  %755 = vmatpush2.bf16.msra.mxu1 %v1285_v44  ;;  %v1368_v43 = vld [vmem:[#allocation5 + $0x280] ss:$8 sps:$4 sm:$0xff]   ;;  %v1068_v44 = vcombine.low %v1532_v12, %v1532_v12  ;;  %v163_v12 = vld [vmem:[%s1550_s2] sm:$0x3] }
  0x52   :  { %756 = vmatprep.subr.bf16.mxu1 %v1289_v45  ;;  %v1374_v45 = vld [vmem:[#allocation7 + $0x78] sm:$0xff]  }
  0x54   :  { %716 = vmatpush2.bf16.msra.mxu0 %v1288_v47  ;;  %v1376_v47 = vld [vmem:[#allocation7 + $0x70] sm:$0xff]  }
  0x55   :  { %717 = vmatprep.subr.bf16.mxu0 %v1292_v49  ;;  %757 = vmatpush2.bf16.msra.mxu1 %v1291_v51  ;;  %v1378_v49 = vld [vmem:[#allocation7 + $0x68] sm:$0xff]   ;;  %v1380_v51 = vld [vmem:[#allocation7 + $0x60] sm:$0xff]  }
  0x56   :  { %758 = vmatprep.subr.bf16.mxu1 %v1295_v53  ;;  %v1382_v53 = vld [vmem:[#allocation7 + $0x58] sm:$0xff]  }
  0x58   :  { %718 = vmatpush2.bf16.msra.mxu0 %v1294_v54  ;;  %v1383_v54 = vld [vmem:[#allocation7 + $0x18] sm:$0xff]  }
  0x59   :  { %719 = vmatprep.subr.bf16.mxu0 %v1298_v55  ;;  %759 = vmatpush2.bf16.msra.mxu1 %v1297_v56  ;;  %v1384_v55 = vld [vmem:[#allocation7 + $0x50] sm:$0xff]  }
  0x5a   :  { %760 = vmatprep.subr.bf16.mxu1 %v1301_v57  ;;  %v1385_v56 = vld [vmem:[#allocation7 + $0x10] sm:$0xff]   ;;  %v1386_v57 = vld [vmem:[#allocation7 + $0x48] sm:$0xff]  }
  0x5c   :  { %720 = vmatpush2.bf16.msra.mxu0 %v1300_v58  ;;  %v1387_v58 = vld [vmem:[#allocation7 + $0x8] sm:$0xff]  }
  0x5d   :  { %721 = vmatprep.subr.bf16.mxu0 %v1304_v59  ;;  %761 = vmatpush2.bf16.msra.mxu1 %v1303_v60  ;;  %v1388_v59 = vld [vmem:[#allocation7 + $0x40] sm:$0xff]  }
  0x5e   :  { %762 = vmatprep.subr.bf16.mxu1 %v1307_v61  ;;  %v1389_v60 = vld [vmem:[#allocation7] sm:$0xff]  }
  0x60   :  { %722 = vmatpush2.bf16.msra.mxu0 %v1306_v62 }
  0x61   :  { %723 = vmatprep.subr.bf16.mxu0 %v1310_v63  ;;  %763 = vmatpush2.bf16.msra.mxu1 %v1309_v0 }
  0x62   :  { %764 = vmatprep.subr.bf16.mxu1 %v1313_v1 }
  0x64   :  { %724 = vmatpush2.bf16.msra.mxu0 %v1312_v2 }
  0x65   :  { %775 = vmatprep.subr.bf16.mxu0 %v1320_v3  ;;  %765 = vmatpush2.bf16.msra.mxu1 %v1317_v4 }
  0x66   :  { %830 = vmatprep.subr.bf16.mxu1 %v1367_v9  ;;  %v165_v9 = vlaneseq }
  0x67   :  { %726 = vmatmul.mubr.bf16.vlgmr.msra.gmra.mxu0 %v1064_v5 }
  0x68   :  { %776 = vmatpush1.bf16.msra.mxu0 %v1318_v6  ;;  %767 = vmatmul.mubr.bf16.vlgmr.msra.gmra.mxu1 %v1066_v7 }
  0x69   :  { %777 = vmatprep.subr.bf16.mxu0 %v1325_v8  ;;  %831 = vmatpush1.bf16.msra.mxu1 %v1365_v10  ;;  %v166_v10 = vshrl.u32 %v165_v9, 7 }
  0x6a   :  { %848 = vmatprep.mubr.bf16.mxu1 %v1491_v16  ;;  %807 = vmatprep.mubr.bf16.mxu0 %v1069_v14 }
  0x6b   :  { %1189 = vmatprep.subr.bf16.mxu1 %v1374_v45 }
  0x6c   :  { %778 = vmatpush1.bf16.msra.mxu0 %v1323_v11  ;;  %v167_v11 = vsub.s32 0, %v166_v10 }
  0x6d   :  { %779 = vmatprep.subr.bf16.mxu0 %v1328_v13  ;;  %v171_v13 = vsub.s32 1, %v166_v10 }
  0x6e   :  { %v168_v14 = vrot.slane %v163_v12, %v167_v11 }
  0x70   :  { %780 = vmatpush1.bf16.msra.mxu0 %v1326_v15  ;;  %1169 = vmatmul.mubr.msk.bf16.vlgmr.msra.gmra.mxu1 %vm689_vm0, %v1371_v18  ;;  %v172_v15 = vrot.slane %v163_v12, %v171_v13 }
  0x71   :  { %781 = vmatprep.subr.bf16.mxu0 %v1331_v17  ;;  %1190 = vmatpush3.bf16.msra.mxu1 %v1375_v46 }
  0x72   :  { %1191 = vmatprep.subr.bf16.mxu1 %v1376_v47 }
  0x74   :  { %782 = vmatpush1.bf16.msra.mxu0 %v1329_v19 }
  0x75   :  { %783 = vmatprep.subr.bf16.mxu0 %v1334_v20  ;;  %1192 = vmatpush3.bf16.msra.mxu1 %v1377_v48 }
  0x76   :  { %1193 = vmatprep.subr.bf16.mxu1 %v1378_v49 }
  0x78   :  { %784 = vmatpush1.bf16.msra.mxu0 %v1332_v21 }
  0x79   :  { %785 = vmatprep.subr.bf16.mxu0 %v1337_v22  ;;  %1194 = vmatpush3.bf16.msra.mxu1 %v1379_v50 }
  0x7a   :  { %1195 = vmatprep.subr.bf16.mxu1 %v1380_v51 }
  0x7c   :  { %786 = vmatpush1.bf16.msra.mxu0 %v1335_v23 }
  0x7d   :  { %787 = vmatprep.subr.bf16.mxu0 %v1340_v24  ;;  %1196 = vmatpush3.bf16.msra.mxu1 %v1381_v52 }
  0x7e   :  { %1197 = vmatprep.subr.bf16.mxu1 %v1382_v53 }
  0x80   :  { %788 = vmatpush1.bf16.msra.mxu0 %v1338_v25 }
  0x81   :  { %789 = vmatprep.subr.bf16.mxu0 %v1343_v26  ;;  %1198 = vmatpush3.bf16.msra.mxu1 %v1383_v54 }
  0x82   :  { %1199 = vmatprep.subr.bf16.mxu1 %v1384_v55 }
  0x84   :  { %790 = vmatpush1.bf16.msra.mxu0 %v1341_v27 }
  0x85   :  { %791 = vmatprep.subr.bf16.mxu0 %v1346_v28  ;;  %1200 = vmatpush3.bf16.msra.mxu1 %v1385_v56 }
  0x86   :  { %1201 = vmatprep.subr.bf16.mxu1 %v1386_v57 }
  0x88   :  { %792 = vmatpush2.bf16.msra.mxu0 %v1344_v29 }
  0x89   :  { %793 = vmatprep.subr.bf16.mxu0 %v1349_v30  ;;  %1202 = vmatpush3.bf16.msra.mxu1 %v1387_v58 }
  0x8a   :  { %1203 = vmatprep.subr.bf16.mxu1 %v1388_v59 }
  0x8c   :  { %794 = vmatpush2.bf16.msra.mxu0 %v1347_v31 }
  0x8d   :  { %795 = vmatprep.subr.bf16.mxu0 %v1352_v32  ;;  %1204 = vmatpush3.bf16.msra.mxu1 %v1389_v60 }
  0x90   :  { %796 = vmatpush2.bf16.msra.mxu0 %v1350_v33 }
  0x91   :  { %797 = vmatprep.subr.bf16.mxu0 %v1355_v34 }
  0x94   :  { %798 = vmatpush2.bf16.msra.mxu0 %v1353_v35 }
  0x95   :  { %799 = vmatprep.subr.bf16.mxu0 %v1358_v36 }
  0x98   :  { %800 = vmatpush2.bf16.msra.mxu0 %v1356_v37 }
  0x99   :  { %801 = vmatprep.subr.bf16.mxu0 %v1361_v38 }
  0x9c   :  { %802 = vmatpush2.bf16.msra.mxu0 %v1359_v39  ;;  %v1172_v39 = vld [vmem:[%s1552_s4] ss:$0 sm:$0xff] }
  0x9d   :  { %803 = vmatprep.subr.bf16.mxu0 %v1364_v40 }
  0xa0   :  { %804 = vmatpush2.bf16.msra.mxu0 %v1362_v41 }
  0xa1   :  { %805 = vmatprep.subr.bf16.mxu0 %v1370_v42 }
  0xa4   :  { %806 = vmatpush2.bf16.msra.mxu0 %v1368_v43 }
  0xa7   :  { %808 = vmatmul.mubr.bf16.vlgmr.msra.gmra.mxu0 %v1068_v44 }
 0x127   :  { %v727_v61 = vpop.f32.mrf.mxu0 }
 0x128   :  { %v768_v63 = vpop.f32.mrf.mxu1  ;;  %v728_v16 = vadd.f32 %v727_v61, %v168_v14 }
 0x129   :  { %v729_v62 = vpop.f32.mrf.mxu0 }
 0x12a   :  { %v770_v1 = vpop.f32.mrf.mxu1  ;;  %v730_v17 = vadd.f32 %v729_v62, %v172_v15  ;;  %v769_v18 = vadd.f32 %v768_v63, %v728_v16 }
 0x12b   :  { %v731_v0 = vpop.f32.mrf.mxu0 }
 0x12c   :  { %v772_v3 = vpop.f32.mrf.mxu1  ;;  %v771_v20 = vadd.f32 %v770_v1, %v730_v17 }
 0x12d   :  { %v732_v2 = vpop.f32.mrf.mxu0 }
 0x12e   :  { %v773_v4 = vpop.f32.mrf.mxu1 }
 0x130   :  { %v850_v5 = vpop.f32.mrf.mxu1 }
 0x132   :  { %v852_v6 = vpop.f32.mrf.mxu1 }
 0x134   :  { %v854_v7 = vpop.f32.mrf.mxu1 }
 0x136   :  { %v855_v8 = vpop.f32.mrf.mxu1 }
 0x167   :  { %v809_v19 = vpop.f32.mrf.mxu0 }
 0x168   :  { %v810_v21 = vadd.f32 %v809_v19, %v769_v18 }
 0x169   :  { %v811_v22 = vpop.f32.mrf.mxu0 }
 0x16a   :  { %v851_v23 = vadd.f32 %v850_v5, %v810_v21  ;;  %v812_v24 = vadd.f32 %v811_v22, %v771_v20 }
 0x16b   :  { %v813_v25 = vpop.f32.mrf.mxu0 }
 0x16c   :  { %v1170_v26 = vmul.f32 -1.442695, %v851_v23  ;;  %v853_v27 = vadd.f32 %v852_v6, %v812_v24 }
 0x16d   :  { %v814_v28 = vpop.f32.mrf.mxu0 }
 0x16e   :  { %1390 = vpow2.f32 %v1170_v26  ;;  %v1171_v29 = vmul.f32 -1.442695, %v853_v27 }
 0x170   :  { %1392 = vpow2.f32 %v1171_v29 }
 0x17b   :  { %v1391_v30 = vpop.eup %1390 }
 0x17c   :  { %v863_v31 = vadd.f32 1.0, %v1391_v30 }
 0x17d   :  { %v1393_v32 = vpop.eup %1392 }
 0x17e   :  { %v864_v33 = vadd.f32 1.0, %v1393_v32  ;;  %1394 = vrcp.f32 %v863_v31 }
 0x180   :  { %1396 = vrcp.f32 %v864_v33 }
 0x18b   :  { %v1395_v34 = vpop.eup %1394 }
 0x18c   :  { %v869_v37 = vpack.c.bf16 %v1395_v34, %v1395_v34 }
 0x18d   :  { %v1397_v35 = vpop.eup %1396 }
 0x18e   :  { %v870_v36 = vpack.c.bf16 %v1397_v35, %v1397_v35 }
 0x190   :  { %1038 = vmatprep.mubr.bf16.mxu1 %v870_v36 }
 0x191   :  { %1039 = vmatmul.mubr.bf16.vlgmr.msra.gmra.mxu1 %v869_v37 }
 0x251   :  { %v1205_v38 = vpop.f32.mrf.mxu1 }
 0x253   :  { %v1206_v40 = vpop.f32.mrf.mxu1 }
 0x254   :  { %v1207_v41 = vadd.f32 %v1206_v40, %v1205_v38 }
 0x255   :  { %v1208_v42 = vpop.f32.mrf.mxu1 }
 0x256   :  { %v1041_v43 = vadd.f32 %v1207_v41, %v1172_v39 }
 0x257   :  { %v1209_v44 = vpop.f32.mrf.mxu1 }
 0x258   :  { %v1046_v45 = vpack.c.bf16 %v1041_v43, %v1041_v43 }
 0x25a   :  { %1047 = vst [vmem:[#allocation8] sm:$0xf] %v1046_v45 }
 0x25b   :  { %1469 = shalt.err (!%p1466_p5)
}
 0x25c   :  { %1057 = dma.vmem_to_hbm [thread:$0]  %s1055_s13, 64, %s1553_s5, [#allocation4]  }
 0x25d   :  { %1482 = dma.done.wait [#allocation4], 64  }
 0x25e   :  { %1483 = vsyncadd [#allocation4], 4294967232 }
 0x25f   :  { %1061 = vsyncpa [#allocation3], 1 }
 0x260   :  { %1062 = vsyncpa [#allocation6], 1 }
 0x261   :  { %1063 = vsyncpa [#allocation4], 1 }

</bundles_post_ra>
